<compile_context>
chip_gen: v6e
topology: v6e:2x2x1
jax: 0.10.0
libtpu: 0.0.40
codegen_flags: <defaults>
</compile_context>

<pallas_src>
import functools

import jax
import jax.numpy as jnp
from jax.experimental import pallas as pl
from jax.experimental.pallas import tpu as pltpu


C_TOTAL = 6  # 4 Y channels + 1 U + 1 V


# --------------------------------------------------------------------------
# Best-effort hardware queries (safe fallbacks if unavailable).
# --------------------------------------------------------------------------
def _tpu_vmem_capacity_bytes():
    try:
        cap = getattr(pltpu.get_tpu_info(), "vmem_capacity_bytes", None)
        if isinstance(cap, int) and cap > 0:
            return cap
    except Exception:
        pass
    return 64 * 1024 * 1024  # conservative (v7x per-TensorCore)


def _detected_num_cores():
    try:
        info = pltpu.get_tpu_info()
    except Exception:
        return 1
    for name in ("num_cores", "core_count", "num_tensorcores",
                 "cores_per_chip", "tensorcore_count"):
        n = getattr(info, name, None)
        if isinstance(n, int) and 1 <= n <= 8:
            return n
    return 1


# --------------------------------------------------------------------------
# Kernel: per-row sum of squared error, accumulated into the resident output.
# --------------------------------------------------------------------------
def _sse_kernel(inp_ref, tgt_ref, out_ref, *, hw, lane_tile, tiles_per_par,
                total_tiles, ragged_last, has_overshoot):
    """inp_ref/tgt_ref: (rows, lane_tile) native-dtype tiles.
    out_ref: (rows, 1) f32 output block, resident across the reduction axis."""
    p = pl.program_id(0)                       # parallel chunk
    j = pl.program_id(1)                       # reduction step within the chunk
    g = p * tiles_per_par + j                  # unclamped global tile id

    @pl.when(j == 0)
    def _init():
        out_ref[...] = jnp.zeros_like(out_ref)

    def _accum(masked):
        d = inp_ref[...].astype(jnp.float32) - tgt_ref[...].astype(jnp.float32)
        if masked:
            lane = jax.lax.broadcasted_iota(jnp.int32, d.shape, 1)
            d = jnp.where(g * lane_tile + lane < hw, d, 0.0)
        # Cross-lane reduce rides the XLU (free slot here); hot loop stays lean.
        out_ref[...] += jnp.sum(d * d, axis=1, keepdims=True)

    num_full = total_tiles - 1 if ragged_last else total_tiles

    if not (ragged_last or has_overshoot):
        _accum(masked=False)                   # common case: no masking at all
    else:
        @pl.when(g < num_full)
        def _interior():                       # unmasked interior tiles
            _accum(masked=False)

        if ragged_last:
            @pl.when(g == total_tiles - 1)
            def _edge():                       # only the ragged tile pays the mask
                _accum(masked=True)
        # Overshoot steps (g >= total_tiles) of a ragged parallel split are
        # skipped entirely (their DMA re-reads the clamped last tile; harmless).


def _choose_lane_tile(rows, hw, itemsize, target_tile_bytes):
    """Pick a lane tile so one native-dtype input tile is ~target_tile_bytes."""
    rows_p = pl.cdiv(rows, 8) * 8                      # sublane padding estimate
    if rows_p * hw * itemsize <= target_tile_bytes:
        return hw                                      # whole row in one tile
    lt = (target_tile_bytes // (rows_p * itemsize)) // 128 * 128
    lt = max(lt, min(512, pl.cdiv(hw, 128) * 128))     # DMA-efficiency floor
    if lt >= hw:
        lt = hw
    return lt


def _per_row_sse(inp2d, tgt2d, lane_tile, num_par, num_cores, vmem_limit_bytes):
    """inp2d/tgt2d: (rows, HW) native dtype. Returns (P, rows, 1) f32 SSE."""
    rows, hw = inp2d.shape
    total_tiles = pl.cdiv(hw, lane_tile)
    num_par = max(1, min(num_par, total_tiles))
    tiles_per_par = pl.cdiv(total_tiles, num_par)
    has_overshoot = num_par * tiles_per_par > total_tiles
    ragged_last = (hw % lane_tile) != 0

    def in_map(p, j):
        g = p * tiles_per_par + j
        if has_overshoot:
            g = jnp.minimum(g, total_tiles - 1)        # keep block reads in bounds
        return (0, g)

    kernel = functools.partial(
        _sse_kernel, hw=hw, lane_tile=lane_tile, tiles_per_par=tiles_per_par,
        total_tiles=total_tiles, ragged_last=ragged_last,
        has_overshoot=has_overshoot)

    if num_par > 1 and num_par <= num_cores and hasattr(pltpu, "CORE_PARALLEL"):
        # Only CORE_PARALLEL actually shards a grid axis across TensorCores.
        dims = (pltpu.CORE_PARALLEL, pltpu.ARBITRARY)
    elif num_par > 1:
        dims = ("parallel", "arbitrary")
    else:
        dims = ("arbitrary", "arbitrary")

    grid_spec = pltpu.PrefetchScalarGridSpec(
        num_scalar_prefetch=0,
        grid=(num_par, tiles_per_par),
        in_specs=[
            pl.BlockSpec((rows, lane_tile), in_map),
            pl.BlockSpec((rows, lane_tile), in_map),
        ],
        out_specs=pl.BlockSpec((None, rows, 1), lambda p, j: (p, 0, 0)),
    )

    return pl.pallas_call(
        kernel,
        out_shape=jax.ShapeDtypeStruct((num_par, rows, 1), jnp.float32),
        grid_spec=grid_spec,
        compiler_params=pltpu.CompilerParams(
            dimension_semantics=dims,
            vmem_limit_bytes=vmem_limit_bytes,
        ),
    )(inp2d, tgt2d)


@functools.partial(jax.jit, static_argnames=("weight_mode", "lane_tile", "num_par"))
def yuv420_loss(inp, tgt, weight_mode="611", lane_tile=None, num_par=None):
    """inp, tgt: (N, 6, H, W) arrays (NCHW, like the PyTorch module)."""
    assert inp.shape == tgt.shape
    N, C, H, W = inp.shape
    assert C == C_TOTAL

    rows = N * C_TOTAL
    hw = H * W

    # Generation-aware VMEM budget: ~96 MiB limit / 12 MiB tiles on 128-MiB
    # parts (v5e/v6e), ~48 MiB / 10 MiB on 64-MiB-per-core parts (v7x).
    cap = _tpu_vmem_capacity_bytes()
    vmem_limit = min(96 * 1024 * 1024, (3 * cap) // 4)
    target_tile = min(12 * 1024 * 1024,
                      max(4 * 1024 * 1024, (vmem_limit - 8 * 1024 * 1024) // 4))

    num_cores = _detected_num_cores()
    if num_par is None:
        num_par = num_cores                    # 1 on v5e/v6e, TC count on v7x

    itemsize = jnp.dtype(inp.dtype).itemsize
    if lane_tile is None:
        lane_tile = _choose_lane_tile(rows, hw, itemsize, target_tile)
    else:
        lane_tile = int(lane_tile)
        if lane_tile >= hw:
            lane_tile = hw
        else:
            lane_tile = max(128, (lane_tile // 128) * 128)

    # Free reshapes (NCHW is contiguous); no transpose, no pad, no dtype cast.
    inp2d = inp.reshape(rows, hw)
    tgt2d = tgt.reshape(rows, hw)

    partial = _per_row_sse(inp2d, tgt2d, lane_tile, num_par, num_cores,
                           vmem_limit)                    # (P, N*6, 1) f32
    sse_rows = jnp.sum(partial, axis=(0, 2))              # (N*6,)
    sse_c = sse_rows.reshape(N, C_TOTAL).sum(axis=0)      # (6,) per-channel SSE

    denom = jnp.float32(N * H * W)
    y_loss = jnp.sum(sse_c[:4]) / (4.0 * denom)           # mean over N*4*H*W
    u_loss = sse_c[4] / denom
    v_loss = sse_c[5] / denom

    if weight_mode == "611":
        total = (y_loss * 6.0 + u_loss + v_loss) / 8.0
    else:
        total = (y_loss * 4.0 + u_loss + v_loss) / 6.0
    return total, (y_loss, u_loss, v_loss)


if __name__ == "__main__":
    key = jax.random.PRNGKey(0)

    def ref_loss(x, t, mode):
        y = jnp.mean((x[:, :4] - t[:, :4]) ** 2)
        u = jnp.mean((x[:, 4:5] - t[:, 4:5]) ** 2)
        v = jnp.mean((x[:, 5:6] - t[:, 5:6]) ** 2)
        tot = (y * (6 if mode == "611" else 4) + u + v) / (8 if mode == "611" else 6)
        return tot, (y, u, v)

    # --- Test 1: default tiling, HW multiple of 128 (single tile, no mask) ----
    k1, k2, key = jax.random.split(key, 3)
    x = jax.random.normal(k1, (2, 6, 16, 16), dtype=jnp.float32)
    t = jax.random.normal(k2, (2, 6, 16, 16), dtype=jnp.float32)
    total, (yl, ul, vl) = yuv420_loss(x, t, weight_mode="611")
    jax.block_until_ready(total)
    tr, (yr, ur, vr) = ref_loss(x, t, "611")
    assert jnp.allclose(total, tr, rtol=1e-5, atol=1e-6)
    assert jnp.allclose(yl, yr, rtol=1e-5, atol=1e-6)
    assert jnp.allclose(ul, ur, rtol=1e-5, atol=1e-6)
    assert jnp.allclose(vl, vr, rtol=1e-5, atol=1e-6)

    # --- Test 2: forced small tile -> interior/edge/overshoot branches --------
    k3, k4, key = jax.random.split(key, 3)
    x2 = jax.random.normal(k3, (2, 6, 24, 24), dtype=jnp.float32)
    t2 = jax.random.normal(k4, (2, 6, 24, 24), dtype=jnp.float32)
    total2, (yl2, ul2, vl2) = yuv420_loss(
        x2, t2, weight_mode="411", lane_tile=128, num_par=2)
    jax.block_until_ready(total2)
    tr2, (yr2, ur2, vr2) = ref_loss(x2, t2, "411")
    assert jnp.allclose(total2, tr2, rtol=1e-5, atol=1e-6)
    assert jnp.allclose(yl2, yr2, rtol=1e-5, atol=1e-6)
    assert jnp.allclose(ul2, ur2, rtol=1e-5, atol=1e-6)
    assert jnp.allclose(vl2, vr2, rtol=1e-5, atol=1e-6)

    # --- Test 3: default tiling, HW not a multiple of 128 (full-row tile) -----
    k5, k6, key = jax.random.split(key, 3)
    x3 = jax.random.normal(k5, (1, 6, 20, 20), dtype=jnp.float32)
    t3 = jax.random.normal(k6, (1, 6, 20, 20), dtype=jnp.float32)
    total3, (yl3, ul3, vl3) = yuv420_loss(x3, t3, weight_mode="611")
    jax.block_until_ready(total3)
    tr3, (yr3, ur3, vr3) = ref_loss(x3, t3, "611")
    assert jnp.allclose(total3, tr3, rtol=1e-5, atol=1e-6)
    assert jnp.allclose(yl3, yr3, rtol=1e-5, atol=1e-6)
    assert jnp.allclose(ul3, ur3, rtol=1e-5, atol=1e-6)
    assert jnp.allclose(vl3, vr3, rtol=1e-5, atol=1e-6)

    print("KERNEL_OK")
</pallas_src>

<mosaic_0001>
module attributes {stable_mosaic.version = 11 : i64} {
  func.func @_sse_kernel(%arg0: i32, %arg1: i32, %arg2: memref<12x256xf32, #tpu.memory_space<vmem>>, %arg3: memref<12x256xf32, #tpu.memory_space<vmem>>, %arg4: memref<1x12x1xf32, #tpu.memory_space<vmem>>) attributes {dimension_semantics = [#tpu.dimension_semantics<arbitrary>, #tpu.dimension_semantics<arbitrary>], iteration_bounds = array<i64: 1, 1>, scalar_prefetch = 0 : i64, scratch_operands = 0 : i64, tpu.core_type = #tpu.core_type<tc>, window_params = [{transform_indices = @transform_0, window_bounds = array<i64: 12, 256>}, {transform_indices = @transform_1, window_bounds = array<i64: 12, 256>}, {transform_indices = @transform_2, window_bounds = array<i64: 1, 12, 1>}]} {
    %c0_i32 = arith.constant 0 : i32
    %0 = arith.cmpi eq, %arg1, %c0_i32 : i32
    %1 = arith.extui %0 : i1 to i32
    %c0_i32_0 = arith.constant 0 : i32
    %2 = arith.cmpi ne, %1, %c0_i32_0 : i32
    scf.if %2 {
      %cst_10 = arith.constant 0.000000e+00 : f32
      %15 = vector.broadcast %cst_10 : f32 to vector<12x1xf32>
      %c0_11 = arith.constant 0 : index
      %c0_12 = arith.constant 0 : index
      %c0_13 = arith.constant 0 : index
      %16 = vector.load %arg4[%c0_11, %c0_12, %c0_13] : memref<1x12x1xf32, #tpu.memory_space<vmem>>, vector<1x12x1xf32>
      %17 = vector.shape_cast %16 : vector<1x12x1xf32> to vector<12x1xf32>
      %18 = vector.shape_cast %15 : vector<12x1xf32> to vector<1x12x1xf32>
      tpu.vector_store %arg4[%c0_11, %c0_12, %c0_13], %18 {strides = array<i32>} : memref<1x12x1xf32, #tpu.memory_space<vmem>>, vector<1x12x1xf32>,
    } else {
    }
    %c0 = arith.constant 0 : index
    %c0_1 = arith.constant 0 : index
    %3 = vector.load %arg2[%c0, %c0_1] : memref<12x256xf32, #tpu.memory_space<vmem>>, vector<12x256xf32>
    %c0_2 = arith.constant 0 : index
    %c0_3 = arith.constant 0 : index
    %4 = vector.load %arg3[%c0_2, %c0_3] : memref<12x256xf32, #tpu.memory_space<vmem>>, vector<12x256xf32>
    %5 = arith.subf %3, %4 : vector<12x256xf32>
    %c0_4 = arith.constant 0 : index
    %c0_5 = arith.constant 0 : index
    %c0_6 = arith.constant 0 : index
    %6 = vector.load %arg4[%c0_4, %c0_5, %c0_6] : memref<1x12x1xf32, #tpu.memory_space<vmem>>, vector<1x12x1xf32>
    %7 = vector.shape_cast %6 : vector<1x12x1xf32> to vector<12x1xf32>
    %8 = arith.mulf %5, %5 : vector<12x256xf32>
    %cst = arith.constant dense<0.000000e+00> : vector<12xf32>
    %9 = vector.multi_reduction <add>, %8, %cst [1] : vector<12x256xf32> to vector<12xf32>
    %10 = vector.shape_cast %9 : vector<12xf32> to vector<12x1xf32>
    %11 = arith.addf %7, %10 : vector<12x1xf32>
    %c0_7 = arith.constant 0 : index
    %c0_8 = arith.constant 0 : index
    %c0_9 = arith.constant 0 : index
    %12 = vector.load %arg4[%c0_7, %c0_8, %c0_9] : memref<1x12x1xf32, #tpu.memory_space<vmem>>, vector<1x12x1xf32>
    %13 = vector.shape_cast %12 : vector<1x12x1xf32> to vector<12x1xf32>
    %14 = vector.shape_cast %11 : vector<12x1xf32> to vector<1x12x1xf32>
    tpu.vector_store %arg4[%c0_7, %c0_8, %c0_9], %14 {strides = array<i32>} : memref<1x12x1xf32, #tpu.memory_space<vmem>>, vector<1x12x1xf32>,
    return
  }
  func.func @transform_0(%arg0: i32, %arg1: i32) -> (i32, i32) {
    %c1_i32 = arith.constant 1 : i32
    %0 = arith.muli %arg0, %c1_i32 : i32
    %1 = arith.addi %0, %arg1 : i32
    %c0_i32 = arith.constant 0 : i32
    %c0_i32_0 = arith.constant 0 : i32
    return %c0_i32, %1 : i32, i32
  }
  func.func @transform_1(%arg0: i32, %arg1: i32) -> (i32, i32) {
    %c1_i32 = arith.constant 1 : i32
    %0 = arith.muli %arg0, %c1_i32 : i32
    %1 = arith.addi %0, %arg1 : i32
    %c0_i32 = arith.constant 0 : i32
    %c0_i32_0 = arith.constant 0 : i32
    return %c0_i32, %1 : i32, i32
  }
  func.func @transform_2(%arg0: i32, %arg1: i32) -> (i32, i32, i32) {
    %c0_i32 = arith.constant 0 : i32
    %c0_i32_0 = arith.constant 0 : i32
    %c0_i32_1 = arith.constant 0 : i32
    return %arg0, %c0_i32, %c0_i32_0 : i32, i32, i32
  }
}

</mosaic_0001>

<bundles_post_ra>
// kernel: yuv420_loss.1
= control target key start
LH: loop header
LB: loop body
LE: loop exit
PB: predicated region body
PF: predicated region fallthrough
CT: control target
= control target key end

     0   :  { %vm59_vm0 = vcmask 7168   ;;  %v113_v3 = vmov 0.0   ;;  %vm84_vm1 = vcmask 1043456   ;;  %vm61_vm2 = vcmask 3072   ;;  %s173_s0 = inlined_call_operand.vmem [shape: f32[12,256], index: 0, kind: input, shape index: {}]   ;;  %s174_s1 = inlined_call_operand.vmem [shape: f32[12,256], index: 1, kind: input, shape index: {}]   ;;  %s175_s2 = inlined_call_operand.vmem [shape: f32[1,12,1], index: 2, kind: output, shape index: {}]  }
   0x1   :  { %v63_v0 = vld [vmem:[%s173_s0] sm:$0xff]  ;;  %v64_v1 = vld [vmem:[%s173_s0 + $0x8] sm:$0xff]  ;;  %60 = vst.msk [vmem:[%s175_s2] sm:$0xff] %vm59_vm0, %v113_v3  ;;  %v65_v6 = vld [vmem:[%s173_s0 + $0x10] sm:$0xf] }
   0x2   :  { %v67_v2 = vld [vmem:[%s174_s1] sm:$0xff]  ;;  %v68_v4 = vld [vmem:[%s174_s1 + $0x8] sm:$0xff]  ;;  %v66_v7 = vld [vmem:[%s173_s0 + $0x18] sm:$0xf]  ;;  %62 = vst.msk [vmem:[%s175_s2 + $0x8] sm:$0xf] %vm61_vm2, %v113_v3 }
   0x3   :  { %v71_v5 = vsub.f32 %v63_v0, %v67_v2  ;;  %v72_v8 = vsub.f32 %v64_v1, %v68_v4  ;;  %v69_v9 = vld [vmem:[%s174_s1 + $0x10] sm:$0xf]  ;;  %v70_v10 = vld [vmem:[%s174_s1 + $0x18] sm:$0xf] }
   0x4   :  { %v73_v12 = vsub.f32 %v65_v6, %v69_v9  ;;  %v74_v13 = vsub.f32 %v66_v7, %v70_v10 }
   0x5   :  { %v77_v11 = vmul.f32 %v71_v5, %v71_v5  ;;  %v78_v14 = vmul.f32 %v72_v8, %v72_v8 }
   0x6   :  { %v79_v15 = vmul.f32 %v73_v12, %v73_v12  ;;  %v80_v16 = vmul.f32 %v74_v13, %v74_v13 }
   0x7   :  { %v81_v17 = vadd.f32 %v78_v14, %v77_v11 }
   0x8   :  { %v85_v18 = vsel %vm84_vm1, %v79_v15, 0.0  ;;  %v86_v19 = vsel %vm84_vm1, %v80_v16, 0.0  ;;  %v75_v21 = vld [vmem:[%s175_s2] sm:$0xff] }
   0x9   :  { %82 = vadd.xlane.f32.xlu0 %v81_v17  ;;  %v87_v20 = vadd.f32 %v86_v19, %v85_v18  ;;  %v76_v24 = vld [vmem:[%s175_s2 + $0x8] sm:$0xf] }
   0xd   :  { %88 = vadd.xlane.f32.xlu0 %v87_v20 }
  0x92   :  { %v83_v22 = vpop.xlane.xlu0 %82 }
  0x93   :  { %v90_v23 = vadd.f32 %v83_v22, %v75_v21 }
  0x95   :  { %93 = vst.msk [vmem:[%s175_s2] sm:$0xff] %vm59_vm0, %v90_v23 }
  0x96   :  { %v89_v25 = vpop.xlane.xlu0 %88 }
  0x97   :  { %v91_v26 = vadd.f32 %v89_v25, %v76_v24 }
  0x99   :  { %95 = vst.msk [vmem:[%s175_s2 + $0x8] sm:$0xf] %vm61_vm2, %v91_v26 }

</bundles_post_ra>
